<compile_context>
chip_gen: v7x
topology: tpu7x:2x2x1
jax: 0.10.0
libtpu: 0.0.40
codegen_flags: <defaults>
</compile_context>

<pallas_src>
import functools

import numpy as np

import jax
import jax.numpy as jnp
from jax.experimental import pallas as pl
from jax.experimental.pallas import tpu as pltpu


# ---------------------------------------------------------------------------
# Tiling / VMEM budgeting helpers
# ---------------------------------------------------------------------------

_VMEM_BLOCK_BUDGET = 24 * 1024 * 1024   # double-buffered (in + out) block bytes
_VMEM_LIMIT_BYTES = 48 * 1024 * 1024    # fits v7x (64 MiB) with headroom
_MAX_TILE_H = 512                       # keep a few grid steps for pipelining


def _round_up(x, m):
    return ((x + m - 1) // m) * m


def _pick_tile_h(H, per_row_bytes, sublane=8):
    """Largest row-tile that fits the VMEM budget, multiple of `sublane`."""
    t = max(sublane, min(_MAX_TILE_H, _VMEM_BLOCK_BUDGET // max(per_row_bytes, 1)))
    # Keep >= ~4 grid steps on large images (pipelining + v7x megacore).
    t = min(t, max(sublane, _round_up(pl.cdiv(H, 4), sublane)))
    t = max(sublane, (t // sublane) * sublane)
    if t >= H:
        return H          # single block covering the full dim is always legal
    return t


def _compiler_params():
    return pltpu.CompilerParams(
        dimension_semantics=("parallel",),
        vmem_limit_bytes=_VMEM_LIMIT_BYTES,
    )


# Byte order of jax.lax.bitcast_convert_type(uint8[..., 4] -> int32), probed
# once so the in-kernel shift amounts are always consistent with the packing.
_BYTE0_IS_LSB = int(
    jax.lax.bitcast_convert_type(jnp.array([1, 0, 0, 0], dtype=jnp.uint8),
                                 jnp.int32)) == 1
_SHIFTS = (0, 8, 16, 24) if _BYTE0_IS_LSB else (24, 16, 8, 0)


# ---------------------------------------------------------------------------
# Kernels
# ---------------------------------------------------------------------------

def _deinterleave_kernel(x_ref, o_ref, *, num_ch, shifts):
    # x_ref: (tile_h, W) int32 -- the C uint8 channel bytes of a pixel packed
    #        into one word (lane-dense input, dense DMA).
    # o_ref: (num_ch, tile_h, W) float32 (CHW layout).
    x = x_ref[...]
    for c in range(num_ch):
        o_ref[c] = ((x >> shifts[c]) & 0xFF).astype(o_ref.dtype)


def _cast_expand_kernel(x_ref, o_ref):
    # x_ref: (tile_h, W); o_ref: (1, tile_h, W). Single-channel cast/copy.
    o_ref[0] = x_ref[...].astype(o_ref.dtype)


def _transpose_cast_kernel(x_ref, o_ref):
    # Generic fallback (non-uint8 multi-channel, or uint8 with C > 4):
    # x_ref: (tile_h, W, C) -> o_ref: (C, tile_h, W).
    o_ref[...] = jnp.transpose(x_ref[...].astype(o_ref.dtype), (2, 0, 1))


# ---------------------------------------------------------------------------
# pallas_call wrappers (one per layout path)
# ---------------------------------------------------------------------------

def _run_packed(packed, num_ch, out_dtype):
    H, W = packed.shape
    wp = _round_up(W, 128)
    per_row = 2 * 4 * (1 + num_ch) * wp          # double-buffered in + out
    tile_h = _pick_tile_h(H, per_row, sublane=8)
    grid = (pl.cdiv(H, tile_h),)
    kernel = functools.partial(_deinterleave_kernel, num_ch=num_ch, shifts=_SHIFTS)
    return pl.pallas_call(
        kernel,
        out_shape=jax.ShapeDtypeStruct((num_ch, H, W), out_dtype),
        grid_spec=pltpu.PrefetchScalarGridSpec(
            num_scalar_prefetch=0,
            grid=grid,
            in_specs=[pl.BlockSpec((tile_h, W), lambda i: (i, 0))],
            out_specs=pl.BlockSpec((num_ch, tile_h, W), lambda i: (0, i, 0)),
        ),
        compiler_params=_compiler_params(),
    )(packed)


def _run_single_channel(x2d, out_dtype):
    H, W = x2d.shape
    in_item = np.dtype(x2d.dtype).itemsize
    out_item = np.dtype(out_dtype).itemsize
    per_row = 2 * _round_up(W, 128) * (in_item + out_item)
    sublane = max(8, 32 // min(in_item, out_item))
    tile_h = _pick_tile_h(H, per_row, sublane=sublane)
    grid = (pl.cdiv(H, tile_h),)
    return pl.pallas_call(
        _cast_expand_kernel,
        out_shape=jax.ShapeDtypeStruct((1, H, W), out_dtype),
        grid_spec=pltpu.PrefetchScalarGridSpec(
            num_scalar_prefetch=0,
            grid=grid,
            in_specs=[pl.BlockSpec((tile_h, W), lambda i: (i, 0))],
            out_specs=pl.BlockSpec((1, tile_h, W), lambda i: (0, i, 0)),
        ),
        compiler_params=_compiler_params(),
    )(x2d)


def _run_transpose(image, out_dtype):
    H, W, C = image.shape
    in_item = np.dtype(image.dtype).itemsize
    out_item = np.dtype(out_dtype).itemsize
    # Input block (tile_h, W, C): C sits in the 128-lane dim (heavily padded);
    # reflect that in the VMEM estimate. Rare path, correctness over speed.
    per_row = 2 * (_round_up(W, 32) * 128 * in_item
                   + C * _round_up(W, 128) * out_item)
    sublane = max(8, 32 // out_item)
    tile_h = _pick_tile_h(H, per_row, sublane=sublane)
    grid = (pl.cdiv(H, tile_h),)
    return pl.pallas_call(
        _transpose_cast_kernel,
        out_shape=jax.ShapeDtypeStruct((C, H, W), out_dtype),
        grid_spec=pltpu.PrefetchScalarGridSpec(
            num_scalar_prefetch=0,
            grid=grid,
            in_specs=[pl.BlockSpec((tile_h, W, C), lambda i: (i, 0, 0))],
            out_specs=pl.BlockSpec((C, tile_h, W), lambda i: (0, i, 0)),
        ),
        compiler_params=_compiler_params(),
    )(image)


# ---------------------------------------------------------------------------
# Public entry point (== ToTensorNoDiv.forward for array inputs)
# ---------------------------------------------------------------------------

@jax.jit
def to_tensor_no_div_pallas(image):
    """image: (H, W, C) or (H, W). Returns (C, H, W); uint8 -> float32, no /255."""
    if image.ndim == 2:
        image = image[:, :, None]                  # HW -> HW1
    H, W, C = image.shape
    out_dtype = jnp.float32 if image.dtype == jnp.uint8 else image.dtype

    if C == 1:
        # Grayscale: pure cast/copy, fully dense both sides.
        return _run_single_channel(image.reshape(H, W), out_dtype)

    if image.dtype == jnp.uint8 and C <= 4:
        # Lane-dense hot path: pack the channel bytes of each pixel into one
        # int32 word. For C < 4 this costs one cheap XLA pad pass; for C == 4
        # the bitcast is free.
        if C < 4:
            image = jnp.pad(image, ((0, 0), (0, 0), (0, 4 - C)))
        packed = jax.lax.bitcast_convert_type(image, jnp.int32)   # (H, W) int32
        return _run_packed(packed, C, out_dtype)

    # TODO(synk): uint8 with C > 4 could also get a packed/lane-dense path;
    # it currently falls back to the generic (lane-padded) transpose kernel.
    return _run_transpose(image, out_dtype)


def _reference(image):
    # Pure-JAX reference of the numpy path of to_tensor_no_div.
    if image.ndim == 2:
        image = image[:, :, None]
    out = jnp.transpose(image, (2, 0, 1))
    if image.dtype == jnp.uint8:
        out = out.astype(jnp.float32)
    return out


if __name__ == "__main__":
    key = jax.random.PRNGKey(0)
    k1, k2, k3, k4 = jax.random.split(key, 4)
    H, W = 16, 16

    examples = [
        # RGBA uint8 -> packed-int32 fast path (C == 4)
        jax.random.randint(k1, (H, W, 4), 0, 256, dtype=jnp.int32).astype(jnp.uint8),
        # RGB uint8 -> channel-padded packed path (C == 3)
        jax.random.randint(k2, (H, W, 3), 0, 256, dtype=jnp.int32).astype(jnp.uint8),
        # grayscale uint8 (2-D input) -> single-channel cast path
        jax.random.randint(k3, (H, W), 0, 256, dtype=jnp.int32).astype(jnp.uint8),
        # float32 HWC -> pass-through permute (no cast, no /255)
        jax.random.uniform(k4, (H, W, 3), dtype=jnp.float32),
    ]

    for img in examples:
        out = to_tensor_no_div_pallas(img)
        jax.block_until_ready(out)
        ref = _reference(img)
        assert out.shape == ref.shape, (out.shape, ref.shape)
        assert out.dtype == ref.dtype, (out.dtype, ref.dtype)
        assert jnp.array_equal(out, ref), "mismatch vs reference"

    print("KERNEL_OK")
</pallas_src>

<mosaic_0001>
module attributes {stable_mosaic.version = 11 : i64} {
  func.func @_deinterleave_kernel(%arg0: i32, %arg1: memref<8x16xi32, #tpu.memory_space<vmem>>, %arg2: memref<4x8x16xf32, #tpu.memory_space<vmem>>) attributes {dimension_semantics = [#tpu.dimension_semantics<parallel>], iteration_bounds = array<i64: 2>, scalar_prefetch = 0 : i64, scratch_operands = 0 : i64, tpu.core_type = #tpu.core_type<tc>, window_params = [{transform_indices = @transform_0, window_bounds = array<i64: 8, 16>}, {transform_indices = @transform_1, window_bounds = array<i64: 4, 8, 16>}]} {
    %c0 = arith.constant 0 : index
    %c0_0 = arith.constant 0 : index
    %0 = vector.load %arg1[%c0, %c0_0] : memref<8x16xi32, #tpu.memory_space<vmem>>, vector<8x16xi32>
    %c0_i32 = arith.constant 0 : i32
    %1 = vector.broadcast %c0_i32 : i32 to vector<8x16xi32>
    %2 = arith.shrsi %0, %1 : vector<8x16xi32>
    %c255_i32 = arith.constant 255 : i32
    %3 = vector.broadcast %c255_i32 : i32 to vector<8x16xi32>
    %4 = arith.andi %2, %3 : vector<8x16xi32>
    %5 = arith.sitofp %4 : vector<8x16xi32> to vector<8x16xf32>
    %c0_1 = arith.constant 0 : index
    %c0_2 = arith.constant 0 : index
    %c0_3 = arith.constant 0 : index
    %6 = vector.load %arg2[%c0_1, %c0_2, %c0_3] : memref<4x8x16xf32, #tpu.memory_space<vmem>>, vector<1x8x16xf32>
    %7 = vector.shape_cast %6 : vector<1x8x16xf32> to vector<8x16xf32>
    %8 = vector.shape_cast %5 : vector<8x16xf32> to vector<1x8x16xf32>
    tpu.vector_store %arg2[%c0_1, %c0_2, %c0_3], %8 {strides = array<i32>} : memref<4x8x16xf32, #tpu.memory_space<vmem>>, vector<1x8x16xf32>,
    %c8_i32 = arith.constant 8 : i32
    %9 = vector.broadcast %c8_i32 : i32 to vector<8x16xi32>
    %10 = arith.shrsi %0, %9 : vector<8x16xi32>
    %c255_i32_4 = arith.constant 255 : i32
    %11 = vector.broadcast %c255_i32_4 : i32 to vector<8x16xi32>
    %12 = arith.andi %10, %11 : vector<8x16xi32>
    %13 = arith.sitofp %12 : vector<8x16xi32> to vector<8x16xf32>
    %c1 = arith.constant 1 : index
    %c0_5 = arith.constant 0 : index
    %c0_6 = arith.constant 0 : index
    %14 = vector.load %arg2[%c1, %c0_5, %c0_6] : memref<4x8x16xf32, #tpu.memory_space<vmem>>, vector<1x8x16xf32>
    %15 = vector.shape_cast %14 : vector<1x8x16xf32> to vector<8x16xf32>
    %16 = vector.shape_cast %13 : vector<8x16xf32> to vector<1x8x16xf32>
    tpu.vector_store %arg2[%c1, %c0_5, %c0_6], %16 {strides = array<i32>} : memref<4x8x16xf32, #tpu.memory_space<vmem>>, vector<1x8x16xf32>,
    %c16_i32 = arith.constant 16 : i32
    %17 = vector.broadcast %c16_i32 : i32 to vector<8x16xi32>
    %18 = arith.shrsi %0, %17 : vector<8x16xi32>
    %c255_i32_7 = arith.constant 255 : i32
    %19 = vector.broadcast %c255_i32_7 : i32 to vector<8x16xi32>
    %20 = arith.andi %18, %19 : vector<8x16xi32>
    %21 = arith.sitofp %20 : vector<8x16xi32> to vector<8x16xf32>
    %c2 = arith.constant 2 : index
    %c0_8 = arith.constant 0 : index
    %c0_9 = arith.constant 0 : index
    %22 = vector.load %arg2[%c2, %c0_8, %c0_9] : memref<4x8x16xf32, #tpu.memory_space<vmem>>, vector<1x8x16xf32>
    %23 = vector.shape_cast %22 : vector<1x8x16xf32> to vector<8x16xf32>
    %24 = vector.shape_cast %21 : vector<8x16xf32> to vector<1x8x16xf32>
    tpu.vector_store %arg2[%c2, %c0_8, %c0_9], %24 {strides = array<i32>} : memref<4x8x16xf32, #tpu.memory_space<vmem>>, vector<1x8x16xf32>,
    %c24_i32 = arith.constant 24 : i32
    %25 = vector.broadcast %c24_i32 : i32 to vector<8x16xi32>
    %26 = arith.shrsi %0, %25 : vector<8x16xi32>
    %c255_i32_10 = arith.constant 255 : i32
    %27 = vector.broadcast %c255_i32_10 : i32 to vector<8x16xi32>
    %28 = arith.andi %26, %27 : vector<8x16xi32>
    %29 = arith.sitofp %28 : vector<8x16xi32> to vector<8x16xf32>
    %c3 = arith.constant 3 : index
    %c0_11 = arith.constant 0 : index
    %c0_12 = arith.constant 0 : index
    %30 = vector.load %arg2[%c3, %c0_11, %c0_12] : memref<4x8x16xf32, #tpu.memory_space<vmem>>, vector<1x8x16xf32>
    %31 = vector.shape_cast %30 : vector<1x8x16xf32> to vector<8x16xf32>
    %32 = vector.shape_cast %29 : vector<8x16xf32> to vector<1x8x16xf32>
    tpu.vector_store %arg2[%c3, %c0_11, %c0_12], %32 {strides = array<i32>} : memref<4x8x16xf32, #tpu.memory_space<vmem>>, vector<1x8x16xf32>,
    return
  }
  func.func @transform_0(%arg0: i32) -> (i32, i32) {
    %c0_i32 = arith.constant 0 : i32
    %c0_i32_0 = arith.constant 0 : i32
    return %arg0, %c0_i32 : i32, i32
  }
  func.func @transform_1(%arg0: i32) -> (i32, i32, i32) {
    %c0_i32 = arith.constant 0 : i32
    %c0_i32_0 = arith.constant 0 : i32
    %c0_i32_1 = arith.constant 0 : i32
    return %c0_i32, %arg0, %c0_i32_0 : i32, i32, i32
  }
}

</mosaic_0001>

<bundles_post_ra>
// kernel: to_tensor_no_div_pallas.1
= control target key start
LH: loop header
LB: loop body
LE: loop exit
PB: predicated region body
PF: predicated region fallthrough
CT: control target
= control target key end

     0   :  { %6 = vsyncpa [#allocation3], 0  ;;  %s444_s0 = inlined_call_operand.vmem [shape: s32[16,16], index: 0, kind: input, shape index: {}]   ;;  %s445_s1 = inlined_call_operand.hbm [shape: f32[4,16,16], index: 1, kind: output, shape index: {}]  }
   0x1   :  { %8 = vsyncpa [#allocation3 + $0x1], 0  ;;  %s341_s6 = smov 0   ;;  %s343_s7 = smov 0  }
   0x2   :  { %s345_s8 = smov 0   ;;  %s347_s9 = smov 0  }
   0x3 LB: > { %s362_s10 = sadd.s32 4294967295, %s325_s9   ;;  %s207_s11 = sadd.s32 4294967294, %s325_s9   ;;  %s325_s9 = sphi %s347_s9, %s451_s9   ;;  %s321_s8 = sphi %s345_s8, %s450_s8   ;;  %s317_s7 = sphi %s343_s7, %s449_s7   ;;  %s313_s6 = sphi %s341_s6, %s448_s6  }
   0x4   : > { %s366_s12 = sadd.s32 1, %s325_s9   ;;  %s47_s13 = sadd.s32 1, %s321_s8 }
   0x5   : > { %s44_s14 = ssub.s32 %s325_s9, %s366_s12  ;;  %p57_p0 = scmp.ne.s32.totalorder %s321_s8, %s317_s7 }
   0x6   : > { %p45_p1 = scmp.eq.s32.totalorder %s44_s14, 0  ;;  %p58_p2 = scmp.eq.s32.totalorder %s362_s10, 1 }
   0x7   : > { %p63_p3 = scmp.ne.s32.totalorder %s317_s7, %s313_s6  ;;  %p64_p4 = scmp.eq.s32.totalorder %s207_s11, 1 }
   0x8   : > { %s377_s15 = scalar_select %p45_p1, %s321_s8, %s47_s13  }
   0x9   : > { %p379_p5 = por %p58_p2, %p57_p0  ;;  %p383_p6 = por %p64_p4, %p63_p3 }
   0xa   : > { %p210_p7 = scmp.ge.s32.totalorder %s325_s9, 1  ;;  %p89_p8 = scmp.lt.s32.totalorder %s325_s9, 3 }
   0xc   : > { %p90_p9 = pnand %p210_p7, %p89_p8 }
   0xd   : > { %s105_s18 = sand.u32 (!%p90_p9), 1, %s317_s7   ;;  %p108_p10 = scmp.lt.s32.totalorder (!%p90_p9), %s362_s10, 1  ;;  %vm115_vm0 = vcmask (!%p90_p9), 130048  }
   0xe   : > { %93 = sbr.rel (%p90_p9) target bundleno = 48 (0x30), region = 24  ;;  %s211_s19 = sshll.u32 (!%p90_p9), %s105_s18, 5 }
   0xf   : > { %s218_s25 = sshll.u32 (!%p90_p9), %s362_s10, 7  ;;  %s107_s26 = scalar_lea.vmem (!%p90_p9), [#allocation2], %s211_s19 }
  0x10   : > { %s145_s27 = sshll.u32 (!%p90_p9), %s107_s26, 4  ;;  %s399_s30 = scalar_lea.hbm (!%p90_p9), %s445_s1, %s218_s25  ;;  %s401_s27 = int_to_ptr.vmem [resolvable:$true] %s145_s27 }
  0x11   : > { %s403_s2 = scalar_lea.sflag (!%p90_p9), [#allocation3], %s105_s18  ;;  %s263_s3 = scalar_lea.vmem (!%p90_p9), %s401_s27, 512 }
  0x12   : > { %p264_p11 = scmp.ne.s32.totalorder (!%p90_p9), %s401_s27, %s263_s3  ;;  %s327_s4 = smov (!%p90_p9), [#allocation2]  }
  0x13   : > { %s267_s5 = sshll.u32 (!%p90_p9), %s327_s4, 4  ;;  %s268_s5 = int_to_ptr.vmem [resolvable:$false] %s267_s5 }
  0x14   : > { %p265_p12 = pnand (!%p90_p9), %p264_p11, %p379_p5  ;;  %p270_p0 = scmp.lt.s32.totalorder (!%p90_p9), %s401_s27, %s268_s5 }
  0x15   : > { %s109_s20 = scalar_select %p108_p10, %s362_s10, 1 }
  0x16   : > { %p266_p13 = pneg %p265_p12  ;;  %s269_s10 = scalar_lea.vmem %s268_s5, 1024 }
  0x17   : > { %s212_s21 = sshll.u32 %s109_s20, 3  ;;  %p271_p1 = scmp.lt.s32.totalorder %s269_s10, %s263_s3 }
  0x18   : > { %s111_s24 = scalar_lea.vmem %s444_s0, %s212_s21 }
  0x19   : > { %v112_v0 = vld [vmem:[%s111_s24] sm:$0xff]  ;;  %p272_p2 = por %p271_p1, %p270_p0 }
  0x1a   : > { %v113_v1 = vand.u32 255, %v112_v0  ;;  %v117_v2 = vshra.s32 %v112_v0, 8  ;;  %v122_v3 = vshra.s32 %v112_v0, 16  ;;  %v215_v4 = vshrl.u32 %v112_v0, 24 }
  0x1b   : > { %p273_p3 = pnand %p272_p2, %p266_p13 }
  0x1c   : > { %v114_v5 = vcvt.s32.f32 %v113_v1  ;;  %v118_v6 = vand.u32 255, %v117_v2  ;;  %v123_v7 = vand.u32 255, %v122_v3  ;;  %v129_v8 = vcvt.s32.f32 %v215_v4 }
  0x1e   : > { %116 = vst.msk [vmem:[%s107_s26] sm:$0xff] %vm115_vm0, %v114_v5  ;;  %v119_v9 = vcvt.s32.f32 %v118_v6  ;;  %v124_v10 = vcvt.s32.f32 %v123_v7  ;;  %216 = vst.msk [vmem:[%s107_s26 + $0x18] sm:$0xff] %vm115_vm0, %v129_v8 }
  0x20   : > { %213 = vst.msk [vmem:[%s107_s26 + $0x8] sm:$0xff] %vm115_vm0, %v119_v9  ;;  %214 = vst.msk [vmem:[%s107_s26 + $0x10] sm:$0xff] %vm115_vm0, %v124_v10 }
  0x21   : > { %276 = shalt.err (!%p273_p3)
}
  0x22   : > { %s277_s11 = scalar_lea.hbm %s399_s30, 512  ;;  %s281_s18 = scalar_lea.hbm %s445_s1, 1024 }
  0x23   : > { %p278_p4 = scmp.ne.s32.totalorder %s399_s30, %s277_s11  ;;  %p282_p9 = scmp.lt.u32.totalorder %s399_s30, %s445_s1 }
  0x24   : > { %p283_p10 = scmp.lt.u32.totalorder %s281_s18, %s277_s11  ;;  %p285_p12 = scmp.lt.u32.totalorder %s277_s11, %s399_s30 }
  0x25   : > { %p279_p7 = pnand %p278_p4, %p379_p5 }
  0x26   : > { %p284_p11 = por %p283_p10, %p282_p9 }
  0x27   : > { %p280_p8 = pneg %p279_p7 }
  0x28   : > { %p286_p13 = por %p285_p12, %p284_p11 }
  0x2a   : > { %p287_p0 = pnand %p286_p13, %p280_p8 }
  0x2c   : > { %290 = shalt.err (!%p287_p0)
}
  0x2d   : > { %s328_s21 = smov 128   ;;  %s329_s22 = smov 256  }
  0x2e   : > { %s330_s23 = smov 8  }
  0x2f   : > { %221 = dma.vmem_to_hbm [thread:$0]  (%p379_p5), %s401_s27, 512, %s399_s30, %s403_s2, %s328_s21, %s329_s22, %s330_s23  }
  0x30 PF: > { %p227_p1 = scmp.ge.s32.totalorder %s325_s9, 2  ;;  %s160_s24 = sand.u32 1, %s313_s6  }
  0x31   : > { %s161_s25 = scalar_lea.sflag [#allocation3], %s160_s24 }
  0x32   : > { %p224_p2 = pnand %p227_p1, %p383_p6 }
  0x34   : > { %308 = dma.done.wait (!%p224_p2), %s161_s25, 512  }
  0x35   : > { %310 = vsyncadd (!%p224_p2), %s161_s25, 4294966784  ;;  %p11_p3 = scmp.ge.s32.totalorder %s366_s12, 4   ;;  %s448_s6 = smov %s317_s7 }
  0x36   : > { %s449_s7 = smov %s321_s8  ;;  %s450_s8 = smov %s377_s15 }
  0x37   : > { %s451_s9 = smov %s366_s12  ;;  %13 = sbr.rel (!%p11_p3) target bundleno = 3 (0x3), region = 62 }
  0x3e   :  { %166 = vsyncpa [#allocation3], 1 }
  0x3f   :  { %168 = vsyncpa [#allocation3 + $0x1], 1 }

</bundles_post_ra>
